<compile_context>
chip_gen: v5e
topology: v5e:2x2
jax: 0.10.0
libtpu: 0.0.40
codegen_flags: <defaults>
</compile_context>

<pallas_src>
from functools import partial

import jax
import jax.numpy as jnp
import numpy as np
from jax.experimental import pallas as pl
from jax.experimental.pallas import tpu as pltpu


def _resnet_block_kernel(x_ref, m_ref, w1_ref, b1_ref, w2_ref, b2_ref, o_ref,
                         col_ref, *, ks, W, N, Cp, Cout, compute_dtype):
    pad = ks // 2
    f32 = jnp.float32

    x = x_ref[...]                                     # (Cp, N) f32, pad rows are zero

    def build_cols(src):
        # col[t*Cp + ci, n] = src[ci, n + d_t] zeroed outside the image,
        # d_t = (kh - pad)*W + (kw - pad).  Rolls wrapping across image/block borders
        # land only on masked (out-of-image) pixels.  Every store writes a full,
        # 8-row-aligned Cp-row group (src pad rows are zero, so groups stay clean).
        for kh in range(ks):
            for kw in range(ks):
                t = kh * ks + kw
                d = (kh - pad) * W + (kw - pad)
                tap = src if d == 0 else pltpu.roll(src, (-d) % N, axis=1)
                if not (kh == pad and kw == pad):
                    tap = tap * m_ref[t:t + 1, :]      # (1, N) 0/1 border mask
                col_ref[t * Cp:(t + 1) * Cp, :] = tap
        return col_ref[...]                            # (ks*ks*Cp, N) compute_dtype

    # ---- conv1: single MXU contraction + bias + LeakyReLU(0.2) ----
    # w1's output dim is zero-padded to Cp, so h's pad rows are exactly 0 and can be
    # fed straight back into build_cols for conv2.
    h = jnp.dot(w1_ref[...], build_cols(x.astype(compute_dtype)),
                preferred_element_type=f32)            # (Cp, N)
    h = h + b1_ref[...]
    h = jnp.where(h > 0, h, 0.2 * h)

    # ---- conv2: single MXU contraction + bias + residual ----
    y = jnp.dot(w2_ref[...], build_cols(h.astype(compute_dtype)),
                preferred_element_type=f32)            # (Cout, N)
    o_ref[...] = (y + b2_ref[...] + x[:Cout, :]).astype(o_ref.dtype)


def _pick_block_batch(B, target=16):
    """Largest divisor of B <= target that also keeps the grid length >= 2."""
    cap = min(target, B)
    if B >= 2:
        cap = min(cap, max(1, B // 2))
    bt = 1
    for d in range(1, cap + 1):
        if B % d == 0:
            bt = d
    return bt


def resnet_block(x_nchw, w1_hwio, b1, w2_hwio, b2, *, ks,
                 compute_dtype=jnp.bfloat16, block_batch=None):
    """x: (B, C, H, W) f32 (PyTorch NCHW); w*: (ks, ks, Ci, Co) HWIO; b*: (Co,).

    compute_dtype controls the MXU operand dtype (bf16 default, f32 accumulation);
    pass jnp.float32 for exact PyTorch-f32 semantics.
    """
    B, C, H, W = x_nchw.shape
    Cout = w1_hwio.shape[-1]
    assert ks % 2 == 1, "ks must be odd so padding = ks // 2 preserves H, W"
    assert w1_hwio.shape[2] == C and w2_hwio.shape[2] == Cout and w2_hwio.shape[3] == Cout
    assert Cout == C, "residual add requires Cin == Cout"

    pad = ks // 2
    HW = H * W
    Cp = ((C + 7) // 8) * 8                 # channel dim padded to a sublane multiple
    K = ks * ks * Cp
    Bt = block_batch if block_batch is not None else _pick_block_batch(B)
    assert B % Bt == 0, "block_batch must divide the batch size"
    N = Bt * HW
    nsteps = B // Bt

    # ---- lane-dense layout: (Cp, B*HW) slab, channels zero-padded to Cp ----
    x_cb = jnp.transpose(x_nchw.reshape(B, C, HW), (1, 0, 2)).reshape(C, B * HW)
    x_cb = jnp.pad(x_cb, ((0, Cp - C), (0, 0)))

    # ---- weights packed to (Cout_pad, ks*ks*Cp); K index = (kh*ks + kw)*Cp + ci ----
    def pack_w(w_hwio, cout_pad):
        co = w_hwio.shape[-1]
        w = jnp.transpose(w_hwio, (3, 0, 1, 2)).reshape(co, ks * ks, C)
        w = jnp.pad(w, ((0, cout_pad - co), (0, 0), (0, Cp - C)))
        return w.reshape(cout_pad, K).astype(compute_dtype)

    w1m = pack_w(w1_hwio, Cp)               # padded output rows -> h pad rows == 0
    w2m = pack_w(w2_hwio, Cout)
    b1c = jnp.pad(b1, (0, Cp - Cout)).reshape(Cp, 1).astype(jnp.float32)
    b2c = jnp.reshape(b2, (Cout, 1)).astype(jnp.float32)

    # ---- per-tap 0/1 border masks, tiled to the Bt-image block width (resident) ----
    hh = jnp.arange(HW, dtype=jnp.int32) // W
    ww = jnp.arange(HW, dtype=jnp.int32) % W
    rows = []
    for kh in range(ks):
        for kw in range(ks):
            dh, dw = kh - pad, kw - pad
            rows.append((hh + dh >= 0) & (hh + dh < H) & (ww + dw >= 0) & (ww + dw < W))
    mask = jnp.tile(jnp.stack(rows).astype(compute_dtype), (1, Bt))   # (ks*ks, N)

    kernel = partial(_resnet_block_kernel, ks=ks, W=W, N=N, Cp=Cp, Cout=Cout,
                     compute_dtype=compute_dtype)

    out = pl.pallas_call(
        kernel,
        out_shape=jax.ShapeDtypeStruct((Cout, B * HW), x_nchw.dtype),
        grid_spec=pltpu.PrefetchScalarGridSpec(
            num_scalar_prefetch=0,
            grid=(nsteps,),
            in_specs=[
                pl.BlockSpec((Cp, N), lambda i: (0, i)),        # x slab (Bt images)
                pl.BlockSpec((ks * ks, N), lambda i: (0, 0)),   # border masks (resident)
                pl.BlockSpec((Cp, K), lambda i: (0, 0)),        # w1 (resident)
                pl.BlockSpec((Cp, 1), lambda i: (0, 0)),        # b1
                pl.BlockSpec((Cout, K), lambda i: (0, 0)),      # w2 (resident)
                pl.BlockSpec((Cout, 1), lambda i: (0, 0)),      # b2
            ],
            out_specs=pl.BlockSpec((Cout, N), lambda i: (0, i)),
            scratch_shapes=[pltpu.VMEM((K, N), compute_dtype)],  # im2col matrix
        ),
        compiler_params=pltpu.CompilerParams(
            dimension_semantics=("parallel",)),
    )(x_cb, mask, w1m, b1c, w2m, b2c)

    return jnp.transpose(out.reshape(Cout, B, HW), (1, 0, 2)).reshape(B, Cout, H, W)


def resnet_block_ref(x_nchw, w1, b1, w2, b2):
    """Pure-JAX reference (NCHW / HWIO) for correctness check."""
    dn = ("NCHW", "HWIO", "NCHW")
    h = jax.lax.conv_general_dilated(x_nchw, w1, (1, 1), "SAME", dimension_numbers=dn)
    h = h + jnp.reshape(b1, (1, -1, 1, 1))
    h = jnp.where(h > 0, h, 0.2 * h)
    h = jax.lax.conv_general_dilated(h, w2, (1, 1), "SAME", dimension_numbers=dn)
    h = h + jnp.reshape(b2, (1, -1, 1, 1))
    return h + x_nchw


if __name__ == "__main__":
    key = jax.random.PRNGKey(0)
    kx, kw1, kb1, kw2, kb2, kx2 = jax.random.split(key, 6)

    C, H, W, ks = 4, 16, 16, 3
    w1 = 0.1 * jax.random.normal(kw1, (ks, ks, C, C), jnp.float32)     # HWIO
    b1 = 0.1 * jax.random.normal(kb1, (C,), jnp.float32)
    w2 = 0.1 * jax.random.normal(kw2, (ks, ks, C, C), jnp.float32)
    b2 = 0.1 * jax.random.normal(kb2, (C,), jnp.float32)

    # Case 1: B=2 (Bt=1, grid=2), exact f32 compute -> tight tolerance.
    x = jax.random.normal(kx, (2, C, H, W), jnp.float32)               # PyTorch NCHW
    out = jax.block_until_ready(
        resnet_block(x, w1, b1, w2, b2, ks=ks, compute_dtype=jnp.float32))
    ref = resnet_block_ref(x, w1, b1, w2, b2)
    np.testing.assert_allclose(np.asarray(out), np.asarray(ref), rtol=1e-4, atol=1e-4)

    # Case 2: B=8 (Bt=4, grid=2), default bf16 MXU operands (f32 accumulation)
    # -> exercises the batched-images-per-step path; slightly looser tolerance.
    x2 = jax.random.normal(kx2, (8, C, H, W), jnp.float32)
    out2 = jax.block_until_ready(resnet_block(x2, w1, b1, w2, b2, ks=ks))
    ref2 = resnet_block_ref(x2, w1, b1, w2, b2)
    np.testing.assert_allclose(np.asarray(out2), np.asarray(ref2), rtol=5e-2, atol=5e-2)

    print("KERNEL_OK")
</pallas_src>

<mosaic_0001>
module attributes {stable_mosaic.version = 11 : i64} {
  func.func @_resnet_block_kernel(%arg0: i32, %arg1: memref<8x256xf32, #tpu.memory_space<vmem>>, %arg2: memref<9x256xf32, #tpu.memory_space<vmem>>, %arg3: memref<8x72xf32, #tpu.memory_space<vmem>>, %arg4: memref<8x1xf32, #tpu.memory_space<vmem>>, %arg5: memref<4x72xf32, #tpu.memory_space<vmem>>, %arg6: memref<4x1xf32, #tpu.memory_space<vmem>>, %arg7: memref<4x256xf32, #tpu.memory_space<vmem>>, %arg8: memref<72x256xf32, #tpu.memory_space<vmem>>) attributes {dimension_semantics = [#tpu.dimension_semantics<parallel>], iteration_bounds = array<i64: 2>, scalar_prefetch = 0 : i64, scratch_operands = 1 : i64, tpu.core_type = #tpu.core_type<tc>, window_params = [{transform_indices = @transform_0, window_bounds = array<i64: 8, 256>}, {pipeline_mode = #tpu.pipeline_mode<synchronous>, transform_indices = @transform_1, window_bounds = array<i64: 9, 256>}, {pipeline_mode = #tpu.pipeline_mode<synchronous>, transform_indices = @transform_2, window_bounds = array<i64: 8, 72>}, {pipeline_mode = #tpu.pipeline_mode<synchronous>, transform_indices = @transform_3, window_bounds = array<i64: 8, 1>}, {pipeline_mode = #tpu.pipeline_mode<synchronous>, transform_indices = @transform_4, window_bounds = array<i64: 4, 72>}, {pipeline_mode = #tpu.pipeline_mode<synchronous>, transform_indices = @transform_5, window_bounds = array<i64: 4, 1>}, {transform_indices = @transform_6, window_bounds = array<i64: 4, 256>}]} {
    %c0 = arith.constant 0 : index
    %c0_0 = arith.constant 0 : index
    %0 = vector.load %arg1[%c0, %c0_0] : memref<8x256xf32, #tpu.memory_space<vmem>>, vector<8x256xf32>
    %c0_1 = arith.constant 0 : index
    %c0_2 = arith.constant 0 : index
    %1 = vector.load %arg3[%c0_1, %c0_2] : memref<8x72xf32, #tpu.memory_space<vmem>>, vector<8x72xf32>
    %c17_i32 = arith.constant 17 : i32
    %2 = tpu.dynamic_rotate %0 by %c17_i32 dim 1 : vector<8x256xf32>, i32 -> vector<8x256xf32>
    %c0_3 = arith.constant 0 : index
    %c0_4 = arith.constant 0 : index
    %3 = vector.load %arg2[%c0_3, %c0_4] : memref<9x256xf32, #tpu.memory_space<vmem>>, vector<1x256xf32>
    %4 = vector.broadcast %3 : vector<1x256xf32> to vector<8x256xf32>
    %5 = arith.mulf %2, %4 : vector<8x256xf32>
    %c0_5 = arith.constant 0 : index
    %c0_6 = arith.constant 0 : index
    %6 = vector.load %arg8[%c0_5, %c0_6] : memref<72x256xf32, #tpu.memory_space<vmem>>, vector<8x256xf32>
    tpu.vector_store %arg8[%c0_5, %c0_6], %5 {strides = array<i32>} : memref<72x256xf32, #tpu.memory_space<vmem>>, vector<8x256xf32>,
    %c16_i32 = arith.constant 16 : i32
    %7 = tpu.dynamic_rotate %0 by %c16_i32 dim 1 : vector<8x256xf32>, i32 -> vector<8x256xf32>
    %c1 = arith.constant 1 : index
    %c0_7 = arith.constant 0 : index
    %8 = vector.load %arg2[%c1, %c0_7] : memref<9x256xf32, #tpu.memory_space<vmem>>, vector<1x256xf32>
    %9 = vector.broadcast %8 : vector<1x256xf32> to vector<8x256xf32>
    %10 = arith.mulf %7, %9 : vector<8x256xf32>
    %c8 = arith.constant 8 : index
    %c0_8 = arith.constant 0 : index
    %11 = vector.load %arg8[%c8, %c0_8] : memref<72x256xf32, #tpu.memory_space<vmem>>, vector<8x256xf32>
    tpu.vector_store %arg8[%c8, %c0_8], %10 {strides = array<i32>} : memref<72x256xf32, #tpu.memory_space<vmem>>, vector<8x256xf32>,
    %c15_i32 = arith.constant 15 : i32
    %12 = tpu.dynamic_rotate %0 by %c15_i32 dim 1 : vector<8x256xf32>, i32 -> vector<8x256xf32>
    %c2 = arith.constant 2 : index
    %c0_9 = arith.constant 0 : index
    %13 = vector.load %arg2[%c2, %c0_9] : memref<9x256xf32, #tpu.memory_space<vmem>>, vector<1x256xf32>
    %14 = vector.broadcast %13 : vector<1x256xf32> to vector<8x256xf32>
    %15 = arith.mulf %12, %14 : vector<8x256xf32>
    %c16 = arith.constant 16 : index
    %c0_10 = arith.constant 0 : index
    %16 = vector.load %arg8[%c16, %c0_10] : memref<72x256xf32, #tpu.memory_space<vmem>>, vector<8x256xf32>
    tpu.vector_store %arg8[%c16, %c0_10], %15 {strides = array<i32>} : memref<72x256xf32, #tpu.memory_space<vmem>>, vector<8x256xf32>,
    %c1_i32 = arith.constant 1 : i32
    %17 = tpu.dynamic_rotate %0 by %c1_i32 dim 1 : vector<8x256xf32>, i32 -> vector<8x256xf32>
    %c3 = arith.constant 3 : index
    %c0_11 = arith.constant 0 : index
    %18 = vector.load %arg2[%c3, %c0_11] : memref<9x256xf32, #tpu.memory_space<vmem>>, vector<1x256xf32>
    %19 = vector.broadcast %18 : vector<1x256xf32> to vector<8x256xf32>
    %20 = arith.mulf %17, %19 : vector<8x256xf32>
    %c24 = arith.constant 24 : index
    %c0_12 = arith.constant 0 : index
    %21 = vector.load %arg8[%c24, %c0_12] : memref<72x256xf32, #tpu.memory_space<vmem>>, vector<8x256xf32>
    tpu.vector_store %arg8[%c24, %c0_12], %20 {strides = array<i32>} : memref<72x256xf32, #tpu.memory_space<vmem>>, vector<8x256xf32>,
    %c32 = arith.constant 32 : index
    %c0_13 = arith.constant 0 : index
    %22 = vector.load %arg8[%c32, %c0_13] : memref<72x256xf32, #tpu.memory_space<vmem>>, vector<8x256xf32>
    tpu.vector_store %arg8[%c32, %c0_13], %0 {strides = array<i32>} : memref<72x256xf32, #tpu.memory_space<vmem>>, vector<8x256xf32>,
    %c255_i32 = arith.constant 255 : i32
    %23 = tpu.dynamic_rotate %0 by %c255_i32 dim 1 : vector<8x256xf32>, i32 -> vector<8x256xf32>
    %c5 = arith.constant 5 : index
    %c0_14 = arith.constant 0 : index
    %24 = vector.load %arg2[%c5, %c0_14] : memref<9x256xf32, #tpu.memory_space<vmem>>, vector<1x256xf32>
    %25 = vector.broadcast %24 : vector<1x256xf32> to vector<8x256xf32>
    %26 = arith.mulf %23, %25 : vector<8x256xf32>
    %c40 = arith.constant 40 : index
    %c0_15 = arith.constant 0 : index
    %27 = vector.load %arg8[%c40, %c0_15] : memref<72x256xf32, #tpu.memory_space<vmem>>, vector<8x256xf32>
    tpu.vector_store %arg8[%c40, %c0_15], %26 {strides = array<i32>} : memref<72x256xf32, #tpu.memory_space<vmem>>, vector<8x256xf32>,
    %c241_i32 = arith.constant 241 : i32
    %28 = tpu.dynamic_rotate %0 by %c241_i32 dim 1 : vector<8x256xf32>, i32 -> vector<8x256xf32>
    %c6 = arith.constant 6 : index
    %c0_16 = arith.constant 0 : index
    %29 = vector.load %arg2[%c6, %c0_16] : memref<9x256xf32, #tpu.memory_space<vmem>>, vector<1x256xf32>
    %30 = vector.broadcast %29 : vector<1x256xf32> to vector<8x256xf32>
    %31 = arith.mulf %28, %30 : vector<8x256xf32>
    %c48 = arith.constant 48 : index
    %c0_17 = arith.constant 0 : index
    %32 = vector.load %arg8[%c48, %c0_17] : memref<72x256xf32, #tpu.memory_space<vmem>>, vector<8x256xf32>
    tpu.vector_store %arg8[%c48, %c0_17], %31 {strides = array<i32>} : memref<72x256xf32, #tpu.memory_space<vmem>>, vector<8x256xf32>,
    %c240_i32 = arith.constant 240 : i32
    %33 = tpu.dynamic_rotate %0 by %c240_i32 dim 1 : vector<8x256xf32>, i32 -> vector<8x256xf32>
    %c7 = arith.constant 7 : index
    %c0_18 = arith.constant 0 : index
    %34 = vector.load %arg2[%c7, %c0_18] : memref<9x256xf32, #tpu.memory_space<vmem>>, vector<1x256xf32>
    %35 = vector.broadcast %34 : vector<1x256xf32> to vector<8x256xf32>
    %36 = arith.mulf %33, %35 : vector<8x256xf32>
    %c56 = arith.constant 56 : index
    %c0_19 = arith.constant 0 : index
    %37 = vector.load %arg8[%c56, %c0_19] : memref<72x256xf32, #tpu.memory_space<vmem>>, vector<8x256xf32>
    tpu.vector_store %arg8[%c56, %c0_19], %36 {strides = array<i32>} : memref<72x256xf32, #tpu.memory_space<vmem>>, vector<8x256xf32>,
    %c239_i32 = arith.constant 239 : i32
    %38 = tpu.dynamic_rotate %0 by %c239_i32 dim 1 : vector<8x256xf32>, i32 -> vector<8x256xf32>
    %c8_20 = arith.constant 8 : index
    %c0_21 = arith.constant 0 : index
    %39 = vector.load %arg2[%c8_20, %c0_21] : memref<9x256xf32, #tpu.memory_space<vmem>>, vector<1x256xf32>
    %40 = vector.broadcast %39 : vector<1x256xf32> to vector<8x256xf32>
    %41 = arith.mulf %38, %40 : vector<8x256xf32>
    %c64 = arith.constant 64 : index
    %c0_22 = arith.constant 0 : index
    %42 = vector.load %arg8[%c64, %c0_22] : memref<72x256xf32, #tpu.memory_space<vmem>>, vector<8x256xf32>
    tpu.vector_store %arg8[%c64, %c0_22], %41 {strides = array<i32>} : memref<72x256xf32, #tpu.memory_space<vmem>>, vector<8x256xf32>,
    %c0_23 = arith.constant 0 : index
    %c0_24 = arith.constant 0 : index
    %43 = vector.load %arg8[%c0_23, %c0_24] : memref<72x256xf32, #tpu.memory_space<vmem>>, vector<72x256xf32>
    %cst = arith.constant dense<0.000000e+00> : vector<8x256xf32>
    %44 = tpu.matmul %1, %43, %cst {dimension_numbers = #tpu.dot_dimension_numbers<[1], [0], [0], [1], [0, 0, 1, 1], [], []>} : vector<8x72xf32>, vector<72x256xf32>, vector<8x256xf32> -> vector<8x256xf32>
    %c0_25 = arith.constant 0 : index
    %c0_26 = arith.constant 0 : index
    %45 = vector.load %arg4[%c0_25, %c0_26] : memref<8x1xf32, #tpu.memory_space<vmem>>, vector<8x1xf32>
    %46 = vector.broadcast %45 : vector<8x1xf32> to vector<8x256xf32>
    %47 = arith.addf %44, %46 : vector<8x256xf32>
    %cst_27 = arith.constant 0.000000e+00 : f32
    %48 = vector.broadcast %cst_27 : f32 to vector<8x256xf32>
    %49 = arith.cmpf ogt, %47, %48 : vector<8x256xf32>
    %cst_28 = arith.constant 2.000000e-01 : f32
    %50 = vector.broadcast %cst_28 : f32 to vector<8x256xf32>
    %51 = arith.mulf %50, %47 : vector<8x256xf32>
    %52 = arith.select %49, %47, %51 : vector<8x256xi1>, vector<8x256xf32>
    %c0_29 = arith.constant 0 : index
    %c0_30 = arith.constant 0 : index
    %53 = vector.load %arg5[%c0_29, %c0_30] : memref<4x72xf32, #tpu.memory_space<vmem>>, vector<4x72xf32>
    %c17_i32_31 = arith.constant 17 : i32
    %54 = tpu.dynamic_rotate %52 by %c17_i32_31 dim 1 : vector<8x256xf32>, i32 -> vector<8x256xf32>
    %c0_32 = arith.constant 0 : index
    %c0_33 = arith.constant 0 : index
    %55 = vector.load %arg2[%c0_32, %c0_33] : memref<9x256xf32, #tpu.memory_space<vmem>>, vector<1x256xf32>
    %56 = vector.broadcast %55 : vector<1x256xf32> to vector<8x256xf32>
    %57 = arith.mulf %54, %56 : vector<8x256xf32>
    %c0_34 = arith.constant 0 : index
    %c0_35 = arith.constant 0 : index
    %58 = vector.load %arg8[%c0_34, %c0_35] : memref<72x256xf32, #tpu.memory_space<vmem>>, vector<8x256xf32>
    tpu.vector_store %arg8[%c0_34, %c0_35], %57 {strides = array<i32>} : memref<72x256xf32, #tpu.memory_space<vmem>>, vector<8x256xf32>,
    %c16_i32_36 = arith.constant 16 : i32
    %59 = tpu.dynamic_rotate %52 by %c16_i32_36 dim 1 : vector<8x256xf32>, i32 -> vector<8x256xf32>
    %c1_37 = arith.constant 1 : index
    %c0_38 = arith.constant 0 : index
    %60 = vector.load %arg2[%c1_37, %c0_38] : memref<9x256xf32, #tpu.memory_space<vmem>>, vector<1x256xf32>
    %61 = vector.broadcast %60 : vector<1x256xf32> to vector<8x256xf32>
    %62 = arith.mulf %59, %61 : vector<8x256xf32>
    %c8_39 = arith.constant 8 : index
    %c0_40 = arith.constant 0 : index
    %63 = vector.load %arg8[%c8_39, %c0_40] : memref<72x256xf32, #tpu.memory_space<vmem>>, vector<8x256xf32>
    tpu.vector_store %arg8[%c8_39, %c0_40], %62 {strides = array<i32>} : memref<72x256xf32, #tpu.memory_space<vmem>>, vector<8x256xf32>,
    %c15_i32_41 = arith.constant 15 : i32
    %64 = tpu.dynamic_rotate %52 by %c15_i32_41 dim 1 : vector<8x256xf32>, i32 -> vector<8x256xf32>
    %c2_42 = arith.constant 2 : index
    %c0_43 = arith.constant 0 : index
    %65 = vector.load %arg2[%c2_42, %c0_43] : memref<9x256xf32, #tpu.memory_space<vmem>>, vector<1x256xf32>
    %66 = vector.broadcast %65 : vector<1x256xf32> to vector<8x256xf32>
    %67 = arith.mulf %64, %66 : vector<8x256xf32>
    %c16_44 = arith.constant 16 : index
    %c0_45 = arith.constant 0 : index
    %68 = vector.load %arg8[%c16_44, %c0_45] : memref<72x256xf32, #tpu.memory_space<vmem>>, vector<8x256xf32>
    tpu.vector_store %arg8[%c16_44, %c0_45], %67 {strides = array<i32>} : memref<72x256xf32, #tpu.memory_space<vmem>>, vector<8x256xf32>,
    %c1_i32_46 = arith.constant 1 : i32
    %69 = tpu.dynamic_rotate %52 by %c1_i32_46 dim 1 : vector<8x256xf32>, i32 -> vector<8x256xf32>
    %c3_47 = arith.constant 3 : index
    %c0_48 = arith.constant 0 : index
    %70 = vector.load %arg2[%c3_47, %c0_48] : memref<9x256xf32, #tpu.memory_space<vmem>>, vector<1x256xf32>
    %71 = vector.broadcast %70 : vector<1x256xf32> to vector<8x256xf32>
    %72 = arith.mulf %69, %71 : vector<8x256xf32>
    %c24_49 = arith.constant 24 : index
    %c0_50 = arith.constant 0 : index
    %73 = vector.load %arg8[%c24_49, %c0_50] : memref<72x256xf32, #tpu.memory_space<vmem>>, vector<8x256xf32>
    tpu.vector_store %arg8[%c24_49, %c0_50], %72 {strides = array<i32>} : memref<72x256xf32, #tpu.memory_space<vmem>>, vector<8x256xf32>,
    %c32_51 = arith.constant 32 : index
    %c0_52 = arith.constant 0 : index
    %74 = vector.load %arg8[%c32_51, %c0_52] : memref<72x256xf32, #tpu.memory_space<vmem>>, vector<8x256xf32>
    tpu.vector_store %arg8[%c32_51, %c0_52], %52 {strides = array<i32>} : memref<72x256xf32, #tpu.memory_space<vmem>>, vector<8x256xf32>,
    %c255_i32_53 = arith.constant 255 : i32
    %75 = tpu.dynamic_rotate %52 by %c255_i32_53 dim 1 : vector<8x256xf32>, i32 -> vector<8x256xf32>
    %c5_54 = arith.constant 5 : index
    %c0_55 = arith.constant 0 : index
    %76 = vector.load %arg2[%c5_54, %c0_55] : memref<9x256xf32, #tpu.memory_space<vmem>>, vector<1x256xf32>
    %77 = vector.broadcast %76 : vector<1x256xf32> to vector<8x256xf32>
    %78 = arith.mulf %75, %77 : vector<8x256xf32>
    %c40_56 = arith.constant 40 : index
    %c0_57 = arith.constant 0 : index
    %79 = vector.load %arg8[%c40_56, %c0_57] : memref<72x256xf32, #tpu.memory_space<vmem>>, vector<8x256xf32>
    tpu.vector_store %arg8[%c40_56, %c0_57], %78 {strides = array<i32>} : memref<72x256xf32, #tpu.memory_space<vmem>>, vector<8x256xf32>,
    %c241_i32_58 = arith.constant 241 : i32
    %80 = tpu.dynamic_rotate %52 by %c241_i32_58 dim 1 : vector<8x256xf32>, i32 -> vector<8x256xf32>
    %c6_59 = arith.constant 6 : index
    %c0_60 = arith.constant 0 : index
    %81 = vector.load %arg2[%c6_59, %c0_60] : memref<9x256xf32, #tpu.memory_space<vmem>>, vector<1x256xf32>
    %82 = vector.broadcast %81 : vector<1x256xf32> to vector<8x256xf32>
    %83 = arith.mulf %80, %82 : vector<8x256xf32>
    %c48_61 = arith.constant 48 : index
    %c0_62 = arith.constant 0 : index
    %84 = vector.load %arg8[%c48_61, %c0_62] : memref<72x256xf32, #tpu.memory_space<vmem>>, vector<8x256xf32>
    tpu.vector_store %arg8[%c48_61, %c0_62], %83 {strides = array<i32>} : memref<72x256xf32, #tpu.memory_space<vmem>>, vector<8x256xf32>,
    %c240_i32_63 = arith.constant 240 : i32
    %85 = tpu.dynamic_rotate %52 by %c240_i32_63 dim 1 : vector<8x256xf32>, i32 -> vector<8x256xf32>
    %c7_64 = arith.constant 7 : index
    %c0_65 = arith.constant 0 : index
    %86 = vector.load %arg2[%c7_64, %c0_65] : memref<9x256xf32, #tpu.memory_space<vmem>>, vector<1x256xf32>
    %87 = vector.broadcast %86 : vector<1x256xf32> to vector<8x256xf32>
    %88 = arith.mulf %85, %87 : vector<8x256xf32>
    %c56_66 = arith.constant 56 : index
    %c0_67 = arith.constant 0 : index
    %89 = vector.load %arg8[%c56_66, %c0_67] : memref<72x256xf32, #tpu.memory_space<vmem>>, vector<8x256xf32>
    tpu.vector_store %arg8[%c56_66, %c0_67], %88 {strides = array<i32>} : memref<72x256xf32, #tpu.memory_space<vmem>>, vector<8x256xf32>,
    %c239_i32_68 = arith.constant 239 : i32
    %90 = tpu.dynamic_rotate %52 by %c239_i32_68 dim 1 : vector<8x256xf32>, i32 -> vector<8x256xf32>
    %c8_69 = arith.constant 8 : index
    %c0_70 = arith.constant 0 : index
    %91 = vector.load %arg2[%c8_69, %c0_70] : memref<9x256xf32, #tpu.memory_space<vmem>>, vector<1x256xf32>
    %92 = vector.broadcast %91 : vector<1x256xf32> to vector<8x256xf32>
    %93 = arith.mulf %90, %92 : vector<8x256xf32>
    %c64_71 = arith.constant 64 : index
    %c0_72 = arith.constant 0 : index
    %94 = vector.load %arg8[%c64_71, %c0_72] : memref<72x256xf32, #tpu.memory_space<vmem>>, vector<8x256xf32>
    tpu.vector_store %arg8[%c64_71, %c0_72], %93 {strides = array<i32>} : memref<72x256xf32, #tpu.memory_space<vmem>>, vector<8x256xf32>,
    %c0_73 = arith.constant 0 : index
    %c0_74 = arith.constant 0 : index
    %95 = vector.load %arg8[%c0_73, %c0_74] : memref<72x256xf32, #tpu.memory_space<vmem>>, vector<72x256xf32>
    %cst_75 = arith.constant dense<0.000000e+00> : vector<4x256xf32>
    %96 = tpu.matmul %53, %95, %cst_75 {dimension_numbers = #tpu.dot_dimension_numbers<[1], [0], [0], [1], [0, 0, 1, 1], [], []>} : vector<4x72xf32>, vector<72x256xf32>, vector<4x256xf32> -> vector<4x256xf32>
    %c0_76 = arith.constant 0 : index
    %c0_77 = arith.constant 0 : index
    %97 = vector.load %arg6[%c0_76, %c0_77] : memref<4x1xf32, #tpu.memory_space<vmem>>, vector<4x1xf32>
    %98 = vector.broadcast %97 : vector<4x1xf32> to vector<4x256xf32>
    %99 = arith.addf %96, %98 : vector<4x256xf32>
    %100 = vector.extract_strided_slice %0 {offsets = [0, 0], sizes = [4, 256], strides = [1, 1]} : vector<8x256xf32> to vector<4x256xf32>
    %101 = arith.addf %99, %100 : vector<4x256xf32>
    %c0_78 = arith.constant 0 : index
    %c0_79 = arith.constant 0 : index
    %102 = vector.load %arg7[%c0_78, %c0_79] : memref<4x256xf32, #tpu.memory_space<vmem>>, vector<4x256xf32>
    tpu.vector_store %arg7[%c0_78, %c0_79], %101 {strides = array<i32>} : memref<4x256xf32, #tpu.memory_space<vmem>>, vector<4x256xf32>,
    return
  }
  func.func @transform_0(%arg0: i32) -> (i32, i32) {
    %c0_i32 = arith.constant 0 : i32
    %c0_i32_0 = arith.constant 0 : i32
    return %c0_i32, %arg0 : i32, i32
  }
  func.func @transform_1(%arg0: i32) -> (i32, i32) {
    %c0_i32 = arith.constant 0 : i32
    %c0_i32_0 = arith.constant 0 : i32
    %c0_i32_1 = arith.constant 0 : i32
    return %c0_i32, %c0_i32_0 : i32, i32
  }
  func.func @transform_2(%arg0: i32) -> (i32, i32) {
    %c0_i32 = arith.constant 0 : i32
    %c0_i32_0 = arith.constant 0 : i32
    %c0_i32_1 = arith.constant 0 : i32
    return %c0_i32, %c0_i32_0 : i32, i32
  }
  func.func @transform_3(%arg0: i32) -> (i32, i32) {
    %c0_i32 = arith.constant 0 : i32
    %c0_i32_0 = arith.constant 0 : i32
    %c0_i32_1 = arith.constant 0 : i32
    return %c0_i32, %c0_i32_0 : i32, i32
  }
  func.func @transform_4(%arg0: i32) -> (i32, i32) {
    %c0_i32 = arith.constant 0 : i32
    %c0_i32_0 = arith.constant 0 : i32
    %c0_i32_1 = arith.constant 0 : i32
    return %c0_i32, %c0_i32_0 : i32, i32
  }
  func.func @transform_5(%arg0: i32) -> (i32, i32) {
    %c0_i32 = arith.constant 0 : i32
    %c0_i32_0 = arith.constant 0 : i32
    %c0_i32_1 = arith.constant 0 : i32
    return %c0_i32, %c0_i32_0 : i32, i32
  }
  func.func @transform_6(%arg0: i32) -> (i32, i32) {
    %c0_i32 = arith.constant 0 : i32
    %c0_i32_0 = arith.constant 0 : i32
    return %c0_i32, %arg0 : i32, i32
  }
}

</mosaic_0001>

<bundles_post_ra>
// kernel: tpu_custom_call.1
= control target key start
LH: loop header
LB: loop body
LE: loop exit
PB: predicated region body
PF: predicated region fallthrough
CT: control target
= control target key end

     0   :  { %11 = vsyncpa [#allocation4], 0  ;;  %s1393_s0 = inlined_call_operand.hbm [shape: f32[8,512], index: 0, kind: input, shape index: {}]   ;;  %s1394_s1 = inlined_call_operand.hbm [shape: f32[9,256], index: 1, kind: input, shape index: {}]   ;;  %s1395_s2 = inlined_call_operand.vmem [shape: f32[8,72], index: 2, kind: input, shape index: {}]   ;;  %s1396_s3 = inlined_call_operand.vmem [shape: f32[8,1], index: 3, kind: input, shape index: {}]   ;;  %s1397_s4 = inlined_call_operand.vmem [shape: f32[4,72], index: 4, kind: input, shape index: {}]   ;;  %s1398_s5 = inlined_call_operand.vmem [shape: f32[4,1], index: 5, kind: input, shape index: {}]   ;;  %s1399_s6 = inlined_call_operand.hbm [shape: f32[4,512], index: 6, kind: output, shape index: {}]  }
   0x1   :  { %13 = vsyncpa [#allocation4 + $0x1], 0 }
   0x2   :  { %14 = vsyncpa [#allocation7], 0 }
   0x3   :  { %15 = vsyncpa [#allocation5], 0 }
   0x4   :  { %17 = vsyncpa [#allocation5 + $0x1], 0  ;;  %s1088_s21 = smov 0   ;;  %s1090_s22 = smov 0  }
   0x5   :  { %s1092_s23 = smov 0   ;;  %s1094_s24 = smov 0  }
   0x6 LB: > { %s196_s27 = sshll.u32 %s1394_s1, 4  ;;  %s1112_s28 = sadd.s32 4294967295, %s1039_s24   ;;  %s1039_s24 = sphi %s1094_s24, %s1409_s24   ;;  %s1035_s23 = sphi %s1092_s23, %s1408_s23   ;;  %s1031_s22 = sphi %s1090_s22, %s1407_s22   ;;  %s1027_s21 = sphi %s1088_s21, %s1406_s21   ;;  %s197_s27 = int_to_ptr.hbm [resolvable:$true] %s196_s27 }
   0x7   : > { %p818_p0 = scmp.ge.s32.totalorder %s1039_s24, 1  ;;  %p44_p1 = scmp.eq.s32.totalorder %s1112_s28, 0 }
   0x8   : > { %p185_p2 = scmp.lt.s32.totalorder %s1039_s24, 3  ;;  %s1041_s30 = smov [#allocation6]  }
   0x9   : > { %s198_s7 = sshll.u32 %s1041_s30, 4  ;;  %s1042_s8 = smov 256   ;;  %s199_s7 = int_to_ptr.vmem [resolvable:$true] %s198_s7 }
   0xa   : > { %p1117_p3 = pnand %p818_p0, %p185_p2  ;;  %s1043_s9 = smov 16  }
   0xb   : > { %s817_s10 = sadd.s32 4294967294, %s1039_s24   ;;  %s1128_s11 = sadd.s32 1, %s1039_s24  }
   0xc   : > { %p847_p4 = pneg %p1117_p3  ;;  %s30_s12 = sadd.s32 1, %s1035_s23 }
   0xd   : > { %s27_s13 = ssub.s32 %s1039_s24, %s1128_s11  ;;  %p37_p7 = scmp.ne.s32.totalorder %s1035_s23, %s1031_s22 }
   0xe   : > { %p848_p6 = pnand %p847_p4, %p44_p1  ;;  %p28_p8 = scmp.eq.s32.totalorder %s27_s13, 0 }
   0xf   : > { %p38_p9 = scmp.eq.s32.totalorder %s1039_s24, 0  ;;  %p43_p10 = scmp.ne.s32.totalorder %s1031_s22, %s1027_s21 }
  0x10   : > { %850 = dma.hbm_to_vmem [thread:$0]  (!%p848_p6), %s197_s27, 512, %s199_s7, [#allocation7], %s1042_s8, %s1042_s8, %s1043_s9  }
  0x11   : > { %p172_p11 = scmp.eq.s32.totalorder %s1112_s28, 1  ;;  %p1144_p12 = por %p44_p1, %p43_p10 }
  0x12   : > { %s1140_s14 = scalar_select %p28_p8, %s1035_s23, %s30_s12  }
  0x13   : > { %p1148_p13 = por %p172_p11, %p37_p7  ;;  %p178_p0 = scmp.eq.s32.totalorder %s817_s10, 1 }
  0x14   : > { %p39_p2 = por %p38_p9, %p37_p7  ;;  %s224_s17 = sand.u32 1, %s1035_s23  }
  0x15   : > { %p1153_p4 = por %p178_p0, %p43_p10  ;;  %p860_p6 = scmp.lt.s32.totalorder %s1039_s24, 2 }
  0x16   : > { %s821_s19 = sshll.u32 %s224_s17, 4  ;;  %s837_s20 = sshll.u32 %s1039_s24, 4 }
  0x17   : > { %s233_s27 = scalar_lea.hbm %s1393_s0, %s837_s20  ;;  %s228_s7 = scalar_lea.vmem [#allocation3], %s821_s19 }
  0x18   : > { %s235_s30 = sshll.u32 %s233_s27, 4  ;;  %s237_s8 = sshll.u32 %s228_s7, 4  ;;  %s236_s30 = int_to_ptr.hbm [resolvable:$true] %s235_s30  ;;  %s238_s8 = int_to_ptr.vmem [resolvable:$true] %s237_s8 }
  0x19   : > { %p1162_p8 = pnand %p860_p6, %p39_p2  ;;  %s225_s10 = scalar_lea.sflag [#allocation4], %s224_s17 }
  0x1a   : > { %s939_s12 = sshra.s32 %s236_s30, 4  ;;  %s946_s19 = scalar_lea.hbm %s1393_s0, 32  ;;  %s940_s12 = int_to_ptr.hbm [resolvable:$true] %s939_s12 }
  0x1b   : > { %s941_s13 = scalar_lea.hbm %s940_s12, 16  ;;  %p943_p9 = pneg %p1162_p8 }
  0x1c   : > { %p942_p7 = scmp.ne.s32.totalorder %s940_s12, %s941_s13  ;;  %p947_p0 = scmp.lt.s32.totalorder %s940_s12, %s1393_s0 }
  0x1d   : > { %p948_p2 = scmp.lt.s32.totalorder %s946_s19, %s941_s13 }
  0x1e   : > { %p944_p10 = pnand %p943_p9, %p942_p7 }
  0x1f   : > { %p949_p6 = por %p948_p2, %p947_p0 }
  0x20   : > { %p945_p11 = pneg %p944_p10 }
  0x22   : > { %p950_p5 = pnand %p949_p6, %p945_p11 }
  0x24   : > { %953 = shalt.err (!%p950_p5)
}
  0x25   : > { %854 = dma.hbm_to_vmem [thread:$0]  (!%p1162_p8), %s236_s30, 256, %s238_s8, %s225_s10  }
  0x26   : > { %246 = sbr.rel (%p1117_p3) target bundleno = 633 (0x279), region = 44  ;;  %s1179_s17 = sand.u32 (!%p1117_p3), 1, %s1031_s22  }
  0x27   : > { %s825_s7 = sshll.u32 (!%p1117_p3), %s1179_s17, 4  ;;  %s249_s20 = scalar_lea.sflag (!%p1117_p3), [#allocation4], %s1179_s17 }
  0x28   : > { %s252_s25 = scalar_lea.vmem (!%p1117_p3), [#allocation3], %s825_s7 }
  0x2b   : > { %1014 = dma.done.wait (%p1144_p12), %s249_s20, 256  }
  0x2c   : > { %1016 = vsyncadd (%p1144_p12), %s249_s20, 4294967040 }
  0x2d   : > { %1018 = dma.done.wait (%p44_p1), [#allocation7], 512  }
  0x2e   : > { %1020 = vsyncadd (%p44_p1), [#allocation7], 4294966784  ;;  %v1191_v0 = vld [vmem:[%s252_s25] sm:$0xff]  ;;  %s1044_s29 = smov 112   ;;  %s1045_s30 = smov 111   ;;  %v1199_v1 = vld [vmem:[%s252_s25 + $0x8] sm:$0xff]  ;;  %v296_v3 = vlaneseq }
  0x2f   : > { %403 = vrot.lane.b32.xlu1 %v1191_v0, %s1044_s29  ;;  %421 = vrot.lane.b32.xlu0 %v1191_v0, %s1045_s30  ;;  %s1046_s8 = smov 113   ;;  %s1047_s15 = smov 127   ;;  %v429_v7 = vld [vmem:[#allocation6 + $0x10] ss:$8 sm:$0x3]  ;;  %v457_v35 = vld [vmem:[%s1396_s3] sm:$0xff] }
  0x30   : > { %385 = vrot.lane.b32.xlu2 %v1191_v0, %s1046_s8  ;;  %s1048_s9 = smov 1   ;;  %s1049_s10 = smov 15   ;;  %v1227_v6 = vand.u32 127, %v296_v3  ;;  %v411_v9 = vld [vmem:[#allocation6 + $0x7] ss:$8 sm:$0x3] }
  0x31   : > { %s1050_s12 = smov 16   ;;  %s1051_s13 = smov 17   ;;  %v431_v10 = vperm.slane %v429_v7, 0  ;;  %v432_v11 = vperm.slane %v429_v7, 1  ;;  %v413_v15 = vperm.slane %v411_v9, 0  ;;  %v414_v16 = vperm.slane %v411_v9, 1 }
  0x32   : > { %vm407_vm0 = vcmp.lt.s32.totalorder %v1227_v6, 112  ;;  %vm425_vm1 = vcmp.lt.s32.totalorder %v1227_v6, 111  ;;  %v393_v12 = vld [vmem:[#allocation6 + $0x6] ss:$8 sm:$0x3]  ;;  %vm389_vm2 = vcmp.lt.s32.totalorder %v1227_v6, 113 }
  0x33   : > { %v395_v23 = vperm.slane %v393_v12, 0  ;;  %v396_v24 = vperm.slane %v393_v12, 1  ;;  %v375_v27 = vld [vmem:[#allocation6 + $0x5] ss:$8 sm:$0x3]  ;;  %vm371_vm3 = vcmp.lt.s32.totalorder %v1227_v6, 127 }
  0x34   : > { %v377_v33 = vperm.slane %v375_v27, 0  ;;  %v378_v34 = vperm.slane %v375_v27, 1  ;;  %v1052_v36 = vmov 0   ;;  %v355_v43 = vld [vmem:[#allocation6 + $0x3] ss:$8 sm:$0x3] }
  0x35   : > { %907 = vset.pattern.permute.xlu1 %v1052_v36  ;;  %908 = vset.pattern.permute.xlu0 %v1052_v36  ;;  %v337_v44 = vld [vmem:[#allocation6 + $0x2] ss:$8 sm:$0x3]  ;;  %vm351_vm4 = vcmp.lt.s32.totalorder %v1227_v6, 1  ;;  %v357_v45 = vperm.slane %v355_v43, 0  ;;  %v358_v46 = vperm.slane %v355_v43, 1 }
  0x36   : > { %vm333_vm5 = vcmp.lt.s32.totalorder %v1227_v6, 15  ;;  %v339_v48 = vperm.slane %v337_v44, 0  ;;  %v340_v49 = vperm.slane %v337_v44, 1  ;;  %v319_v60 = vld [vmem:[#allocation6 + $0x1] ss:$8 sm:$0x3] }
  0x37   : > { %405 = vrot.lane.b32.xlu1 %v1199_v1, %s1044_s29  ;;  %423 = vrot.lane.b32.xlu0 %v1199_v1, %s1045_s30  ;;  %vm315_vm6 = vcmp.lt.s32.totalorder %v1227_v6, 16  ;;  %v321_v61 = vperm.slane %v319_v60, 0  ;;  %v322_v62 = vperm.slane %v319_v60, 1  ;;  %vm298_vm7 = vcmp.lt.s32.totalorder %v1227_v6, 17 }
  0x38   : > { %387 = vrot.lane.b32.xlu2 %v1199_v1, %s1046_s8  ;;  %vm463_vm8 = vcmask 588800   ;;  %v602_v44 = vld [vmem:[#allocation6 + $0x6] ss:$8 sm:$0x3]  ;;  %vm716_vm11 = vcmask 1043456  }
  0x3f   : > { %369 = vrot.lane.b32.xlu1 %v1199_v1, %s1047_s15  ;;  %367 = vrot.lane.b32.xlu0 %v1191_v0, %s1047_s15 }
  0x40   : > { %347 = vrot.lane.b32.xlu2 %v1191_v0, %s1048_s9 }
  0x47   : > { %329 = vrot.lane.b32.xlu1 %v1191_v0, %s1049_s10  ;;  %349 = vrot.lane.b32.xlu0 %v1199_v1, %s1048_s9 }
  0x48   : > { %331 = vrot.lane.b32.xlu2 %v1199_v1, %s1049_s10 }
  0x4f   : > { %313 = vrot.lane.b32.xlu1 %v1199_v1, %s1050_s12  ;;  %311 = vrot.lane.b32.xlu0 %v1191_v0, %s1050_s12 }
  0x50   : > { %292 = vrot.lane.b32.xlu2 %v1191_v0, %s1051_s13 }
  0x57   : > { %294 = vrot.lane.b32.xlu0 %v1199_v1, %s1051_s13  ;;  %460 = vperm.xlu1 %907, %v457_v35  }
  0x8a   : > { %v386_v2 = vpop.permute.xlu2 %385 }
  0x92   : > { %v388_v8 = vpop.permute.xlu2 %387 }
  0x93   : > { %v390_v25 = vsel %vm389_vm2, %v386_v2, %v388_v8  ;;  %v391_v26 = vsel %vm389_vm2, %v388_v8, %v386_v2  ;;  %v301_v8 = vld [vmem:[#allocation6] ss:$8 sm:$0x3] }
  0x94   : > { %v399_v31 = vmul.f32 %v395_v23, %v390_v25  ;;  %v400_v32 = vmul.f32 %v396_v24, %v391_v26 }
  0x9a   : > { %v348_v30 = vpop.permute.xlu2 %347 }
  0xa1   : > { %v404_v4 = vpop.permute.xlu1 %403  ;;  %v422_v5 = vpop.permute.xlu0 %421 }
  0xa2   : > { %v332_v47 = vpop.permute.xlu2 %331 }
  0xa9   : > { %v406_v13 = vpop.permute.xlu1 %405  ;;  %v424_v14 = vpop.permute.xlu0 %423 }
  0xaa   : > { %v408_v17 = vsel %vm407_vm0, %v404_v4, %v406_v13  ;;  %v409_v18 = vsel %vm407_vm0, %v406_v13, %v404_v4  ;;  %v426_v19 = vsel %vm425_vm1, %v422_v5, %v424_v14  ;;  %v427_v20 = vsel %vm425_vm1, %v424_v14, %v422_v5  ;;  %v293_v9 = vpop.permute.xlu2 %292 }
  0xab   : > { %v435_v21 = vmul.f32 %v431_v10, %v426_v19  ;;  %v436_v22 = vmul.f32 %v432_v11, %v427_v20  ;;  %v417_v28 = vmul.f32 %v413_v15, %v408_v17  ;;  %v418_v29 = vmul.f32 %v414_v16, %v409_v18  ;;  %v291_v17 = vld [vmem:[%s1395_s2] sm:$0xff] }
  0xac   : > { %v303_v10 = vperm.slane %v301_v8, 0  ;;  %v304_v11 = vperm.slane %v301_v8, 1 }
  0xad   : > { %474 = vmatpush.msra.mxu0 %v435_v21  ;;  %494 = vmatpush.msra.mxu1 %v436_v22 }
  0xaf   : > { %475 = vmatpush.msra.mxu0 %v417_v28  ;;  %495 = vmatpush.msra.mxu1 %v418_v29  ;;  %v634_v29 = vld [vmem:[#allocation6 + $0x10] ss:$8 sm:$0x3] }
  0xb1   : > { %v370_v37 = vpop.permute.xlu1 %369  ;;  %476 = vmatpush.msra.mxu0 %v399_v31  ;;  %496 = vmatpush.msra.mxu1 %v400_v32  ;;  %v368_v38 = vpop.permute.xlu0 %367  ;;  %v636_v31 = vperm.slane %v634_v29, 0  ;;  %v637_v32 = vperm.slane %v634_v29, 1 }
  0xb2   : > { %v372_v39 = vsel %vm371_vm3, %v368_v38, %v370_v37  ;;  %v373_v40 = vsel %vm371_vm3, %v370_v37, %v368_v38 }
  0xb3   : > { %v381_v41 = vmul.f32 %v377_v33, %v372_v39  ;;  %v382_v42 = vmul.f32 %v378_v34, %v373_v40 }
  0xb5   : > { %477 = vmatpush.msra.mxu0 %v381_v41  ;;  %497 = vmatpush.msra.mxu1 %v382_v42 }
  0xb7   : > { %478 = vmatpush.msra.mxu0 %v1191_v0  ;;  %498 = vmatpush.msra.mxu1 %v1199_v1 }
  0xb9   : > { %v330_v50 = vpop.permute.xlu1 %329  ;;  %v350_v51 = vpop.permute.xlu0 %349 }
  0xba   : > { %v352_v52 = vsel %vm351_vm4, %v348_v30, %v350_v51  ;;  %v353_v53 = vsel %vm351_vm4, %v350_v51, %v348_v30  ;;  %v334_v54 = vsel %vm333_vm5, %v330_v50, %v332_v47  ;;  %v335_v55 = vsel %vm333_vm5, %v332_v47, %v330_v50  ;;  %v618_v30 = vld [vmem:[#allocation6 + $0x7] ss:$8 sm:$0x3]  ;;  %v662_v50 = vld [vmem:[%s1398_s5] sm:$0xf] }
  0xbb   : > { %v361_v56 = vmul.f32 %v357_v45, %v353_v53  ;;  %v362_v57 = vmul.f32 %v358_v46, %v352_v52  ;;  %v343_v58 = vmul.f32 %v339_v48, %v335_v55  ;;  %v344_v59 = vmul.f32 %v340_v49, %v334_v54 }
  0xbc   : > { %v620_v35 = vperm.slane %v618_v30, 0  ;;  %v621_v36 = vperm.slane %v618_v30, 1  ;;  %v604_v47 = vperm.slane %v602_v44, 0  ;;  %v605_v48 = vperm.slane %v602_v44, 1 }
  0xbd   : > { %479 = vmatpush.msra.mxu0 %v361_v56  ;;  %499 = vmatpush.msra.mxu1 %v362_v57  ;;  %v586_v56 = vld [vmem:[#allocation6 + $0x5] ss:$8 sm:$0x3] }
  0xbf   : > { %480 = vmatpush.msra.mxu0 %v343_v58  ;;  %500 = vmatpush.msra.mxu1 %v344_v59  ;;  %v588_v58 = vperm.slane %v586_v56, 0  ;;  %v589_v59 = vperm.slane %v586_v56, 1 }
  0xc1   : > { %v314_v63 = vpop.permute.xlu1 %313  ;;  %v312_v2 = vpop.permute.xlu0 %311 }
  0xc2   : > { %v316_v3 = vsel %vm315_vm6, %v312_v2, %v314_v63  ;;  %v317_v4 = vsel %vm315_vm6, %v314_v63, %v312_v2 }
  0xc3   : > { %v325_v5 = vmul.f32 %v321_v61, %v317_v4  ;;  %v326_v7 = vmul.f32 %v322_v62, %v316_v3  ;;  %v568_v61 = vld [vmem:[#allocation6 + $0x3] ss:$8 sm:$0x3] }
  0xc5   : > { %481 = vmatpush.msra.mxu0 %v325_v5  ;;  %501 = vmatpush.msra.mxu1 %v326_v7  ;;  %v570_v5 = vperm.slane %v568_v61, 0  ;;  %v571_v7 = vperm.slane %v568_v61, 1 }
  0xc9   : > { %v295_v12 = vpop.permute.xlu0 %294  ;;  %v461_v18 = vpop.permute.xlu1 %460 }
  0xca   : > { %v299_v13 = vsel %vm298_vm7, %v293_v9, %v295_v12  ;;  %v300_v14 = vsel %vm298_vm7, %v295_v12, %v293_v9 }
  0xcb   : > { %v307_v15 = vmul.f32 %v303_v10, %v300_v14  ;;  %v308_v16 = vmul.f32 %v304_v11, %v299_v13  ;;  %v552_v10 = vld [vmem:[#allocation6 + $0x2] ss:$8 sm:$0x3] }
  0xcc   : > { %v554_v14 = vperm.slane %v552_v10, 0 }
  0xcd   : > { %482 = vmatpush.msra.mxu0 %v307_v15  ;;  %502 = vmatpush.msra.mxu1 %v308_v16  ;;  %v555_v15 = vperm.slane %v552_v10, 1 }
  0xce   : > { %828 = vmatmul.msk.f32.vlgmr.msra.gmra.mxu0 %vm463_vm8, %v291_v17  ;;  %829 = vmatmul.msk.f32.vlgmr.msra.gmra.mxu1 %vm463_vm8, %v291_v17 }
 0x14b   : > { %v484_v19 = vpop.f32.mrf.mxu0  ;;  %v504_v20 = vpop.f32.mrf.mxu1 }
 0x14c   : > { %v485_v21 = vadd.f32 %v484_v19, %v461_v18  ;;  %v505_v22 = vadd.f32 %v504_v20, %v461_v18 }
 0x14e   : > { %vm507_vm9 = vcmp.gt.f32.partialorder %v485_v21, 0.0  ;;  %v509_v23 = vmul.f32 0.2, %v485_v21  ;;  %vm508_vm10 = vcmp.gt.f32.partialorder %v505_v22, 0.0  ;;  %v510_v24 = vmul.f32 0.2, %v505_v22 }
 0x150   : > { %v1279_v25 = vsel %vm507_vm9, %v485_v21, %v509_v23  ;;  %v1281_v26 = vsel %vm508_vm10, %v505_v22, %v510_v24  ;;  %v536_v22 = vld [vmem:[#allocation6 + $0x1] ss:$8 sm:$0x3]  ;;  %v520_v23 = vld [vmem:[#allocation6] ss:$8 sm:$0x3] }
 0x151   : > { %612 = vrot.lane.b32.xlu1 %v1279_v25, %s1044_s29  ;;  %628 = vrot.lane.b32.xlu2 %v1279_v25, %s1045_s30  ;;  %v538_v24 = vperm.slane %v536_v22, 0  ;;  %v522_v29 = vperm.slane %v520_v23, 0  ;;  %v523_v30 = vperm.slane %v520_v23, 1 }
 0x152   : > { %630 = vrot.lane.b32.xlu0 %v1281_v26, %s1045_s30 }
 0x159   : > { %598 = vrot.lane.b32.xlu1 %v1281_v26, %s1046_s8  ;;  %614 = vrot.lane.b32.xlu2 %v1281_v26, %s1044_s29  ;;  %s989_s29 = scalar_lea.hbm %s1399_s6, 16 }
 0x15a   : > { %596 = vrot.lane.b32.xlu0 %v1279_v25, %s1046_s8  ;;  %s827_s8 = sshll.u32 %s1179_s17, 3 }
 0x161   : > { %562 = vrot.lane.b32.xlu1 %v1279_v25, %s1048_s9  ;;  %580 = vrot.lane.b32.xlu2 %v1279_v25, %s1047_s15 }
 0x162   : > { %582 = vrot.lane.b32.xlu0 %v1281_v26, %s1047_s15  ;;  %s838_s15 = sshll.u32 %s1112_s28, 3  ;;  %s721_s28 = scalar_lea.sflag [#allocation5], %s1179_s17 }
 0x169   : > { %548 = vrot.lane.b32.xlu1 %v1281_v26, %s1049_s10  ;;  %564 = vrot.lane.b32.xlu2 %v1281_v26, %s1048_s9 }
 0x16a   : > { %546 = vrot.lane.b32.xlu0 %v1279_v25, %s1049_s10 }
 0x171   : > { %514 = vrot.lane.b32.xlu1 %v1279_v25, %s1051_s13  ;;  %530 = vrot.lane.b32.xlu2 %v1279_v25, %s1050_s12 }
 0x172   : > { %532 = vrot.lane.b32.xlu0 %v1281_v26, %s1050_s12  ;;  %s732_s12 = scalar_lea.hbm %s1399_s6, %s838_s15 }
 0x173   : > { %s736_s26 = sshll.u32 %s732_s12, 4  ;;  %s737_s26 = int_to_ptr.hbm [resolvable:$true] %s736_s26 }
 0x174   : > { %s983_s27 = sshra.s32 %s737_s26, 4  ;;  %s984_s27 = int_to_ptr.hbm [resolvable:$true] %s983_s27 }
 0x175   : > { %s985_s7 = scalar_lea.hbm %s984_s27, 8  ;;  %p990_p12 = scmp.lt.s32.totalorder %s984_s27, %s1399_s6 }
 0x176   : > { %p986_p1 = scmp.ne.s32.totalorder %s984_s27, %s985_s7  ;;  %p991_p8 = scmp.lt.s32.totalorder %s989_s29, %s985_s7 }
 0x178   : > { %p987_p3 = pnand %p986_p1, %p1148_p13  ;;  %p992_p7 = por %p991_p8, %p990_p12 }
 0x179   : > { %516 = vrot.lane.b32.xlu2 %v1281_v26, %s1051_s13  ;;  %s286_s13 = scalar_lea.vmem [#allocation8], %s827_s8 }
 0x17a   : > { %665 = vperm.xlu0 %908, %v662_v50   ;;  %s734_s19 = sshll.u32 %s286_s13, 4  ;;  %p988_p5 = pneg %p987_p3  ;;  %s735_s19 = int_to_ptr.vmem [resolvable:$true] %s734_s19 }
 0x17c   : > { %p993_p9 = pnand %p992_p7, %p988_p5 }
 0x1ab   : > { %v629_v27 = vpop.permute.xlu2 %628 }
 0x1b3   : > { %v615_v28 = vpop.permute.xlu2 %614 }
 0x1bb   : > { %v581_v41 = vpop.permute.xlu2 %580 }
 0x1c3   : > { %v613_v33 = vpop.permute.xlu1 %612  ;;  %v565_v57 = vpop.permute.xlu2 %564 }
 0x1c4   : > { %v631_v34 = vpop.permute.xlu0 %630  ;;  %v616_v37 = vsel %vm407_vm0, %v613_v33, %v615_v28  ;;  %v617_v38 = vsel %vm407_vm0, %v615_v28, %v613_v33 }
 0x1c5   : > { %v632_v39 = vsel %vm425_vm1, %v629_v27, %v631_v34  ;;  %v633_v40 = vsel %vm425_vm1, %v631_v34, %v629_v27  ;;  %v624_v45 = vmul.f32 %v620_v35, %v616_v37  ;;  %v625_v46 = vmul.f32 %v621_v36, %v617_v38 }
 0x1c6   : > { %v640_v42 = vmul.f32 %v636_v31, %v632_v39  ;;  %v641_v43 = vmul.f32 %v637_v32, %v633_v40  ;;  %v513_v39 = vld [vmem:[%s1397_s4] sm:$0xf] }
 0x1c8   : > { %678 = vmatpush.msra.mxu2 %v640_v42  ;;  %698 = vmatpush.msra.mxu3 %v641_v43 }
 0x1ca   : > { %679 = vmatpush.msra.mxu2 %v624_v45  ;;  %699 = vmatpush.msra.mxu3 %v625_v46 }
 0x1cb   : > { %v599_v49 = vpop.permute.xlu1 %598  ;;  %v531_v11 = vpop.permute.xlu2 %530 }
 0x1cc   : > { %v597_v51 = vpop.permute.xlu0 %596 }
 0x1cd   : > { %v600_v52 = vsel %vm389_vm2, %v597_v51, %v599_v49  ;;  %v601_v53 = vsel %vm389_vm2, %v599_v49, %v597_v51 }
 0x1ce   : > { %v608_v54 = vmul.f32 %v604_v47, %v600_v52  ;;  %v609_v55 = vmul.f32 %v605_v48, %v601_v53 }
 0x1d0   : > { %680 = vmatpush.msra.mxu2 %v608_v54  ;;  %700 = vmatpush.msra.mxu3 %v609_v55 }
 0x1d3   : > { %v563_v60 = vpop.permute.xlu1 %562  ;;  %v517_v27 = vpop.permute.xlu2 %516 }
 0x1d4   : > { %v583_v62 = vpop.permute.xlu0 %582  ;;  %v566_v8 = vsel %vm351_vm4, %v563_v60, %v565_v57  ;;  %v567_v9 = vsel %vm351_vm4, %v565_v57, %v563_v60 }
 0x1d5   : > { %v584_v63 = vsel %vm371_vm3, %v581_v41, %v583_v62  ;;  %v585_v2 = vsel %vm371_vm3, %v583_v62, %v581_v41  ;;  %v574_v12 = vmul.f32 %v570_v5, %v567_v9  ;;  %v575_v13 = vmul.f32 %v571_v7, %v566_v8 }
 0x1d6   : > { %v592_v3 = vmul.f32 %v588_v58, %v584_v63  ;;  %v593_v4 = vmul.f32 %v589_v59, %v585_v2 }
 0x1d8   : > { %681 = vmatpush.msra.mxu2 %v592_v3  ;;  %701 = vmatpush.msra.mxu3 %v593_v4 }
 0x1da   : > { %682 = vmatpush.msra.mxu2 %v1279_v25  ;;  %702 = vmatpush.msra.mxu3 %v1281_v26  ;;  %v539_v25 = vperm.slane %v536_v22, 1 }
 0x1db   : > { %v549_v16 = vpop.permute.xlu1 %548 }
 0x1dc   : > { %683 = vmatpush.msra.mxu2 %v574_v12  ;;  %703 = vmatpush.msra.mxu3 %v575_v13  ;;  %v547_v17 = vpop.permute.xlu0 %546 }
 0x1dd   : > { %v550_v18 = vsel %vm333_vm5, %v547_v17, %v549_v16  ;;  %v551_v19 = vsel %vm333_vm5, %v549_v16, %v547_v17 }
 0x1de   : > { %v558_v20 = vmul.f32 %v554_v14, %v551_v19  ;;  %v559_v21 = vmul.f32 %v555_v15, %v550_v18 }
 0x1e0   : > { %684 = vmatpush.msra.mxu2 %v558_v20  ;;  %704 = vmatpush.msra.mxu3 %v559_v21 }
 0x1e3   : > { %v515_v26 = vpop.permute.xlu1 %514 }
 0x1e4   : > { %v533_v28 = vpop.permute.xlu0 %532  ;;  %v518_v31 = vsel %vm298_vm7, %v515_v26, %v517_v27  ;;  %v519_v32 = vsel %vm298_vm7, %v517_v27, %v515_v26 }
 0x1e5   : > { %v534_v33 = vsel %vm315_vm6, %v531_v11, %v533_v28  ;;  %v535_v34 = vsel %vm315_vm6, %v533_v28, %v531_v11  ;;  %v526_v37 = vmul.f32 %v522_v29, %v519_v32  ;;  %v527_v38 = vmul.f32 %v523_v30, %v518_v31 }
 0x1e6   : > { %v542_v35 = vmul.f32 %v538_v24, %v535_v34  ;;  %v543_v36 = vmul.f32 %v539_v25, %v534_v33 }
 0x1e8   : > { %685 = vmatpush.msra.mxu2 %v542_v35  ;;  %705 = vmatpush.msra.mxu3 %v543_v36 }
 0x1ea   : > { %686 = vmatpush.msra.mxu2 %v526_v37  ;;  %706 = vmatpush.msra.mxu3 %v527_v38 }
 0x1eb   : > { %830 = vmatmul.msk.f32.vlgmr.msra.gmra.mxu2 %vm463_vm8, %v513_v39  ;;  %831 = vmatmul.msk.f32.vlgmr.msra.gmra.mxu3 %vm463_vm8, %v513_v39 }
 0x1ec   : > { %v666_v6 = vpop.permute.xlu0 %665 }
 0x26e   : > { %v688_v40 = vpop.f32.mrf.mxu2  ;;  %v708_v41 = vpop.f32.mrf.mxu3 }
 0x26f   : > { %v689_v42 = vadd.f32 %v688_v40, %v666_v6  ;;  %v709_v43 = vadd.f32 %v708_v41, %v666_v6 }
 0x271   : > { %v712_v44 = vadd.f32 %v709_v43, %v1199_v1  ;;  %v711_v45 = vadd.f32 %v689_v42, %v1191_v0 }
 0x273   : > { %v715_v46 = vrot.slane %v712_v44, 4 }
 0x275   : > { %v717_v47 = vsel %vm716_vm11, %v711_v45, %v715_v46 }
 0x276   : > { %719 = vst [vmem:[%s286_s13] sm:$0xff] %v717_v47 }
 0x277   : > { %996 = shalt.err (!%p993_p9)
}
 0x278   : > { %845 = dma.vmem_to_hbm [thread:$0]  (%p1148_p13), %s735_s19, 128, %s737_s26, %s721_s28  }
 0x279 PF: > { %s748_s17 = sand.u32 1, %s1027_s21   ;;  %p1405_p10 = scmp.ge.s32.totalorder %s1039_s24, 2 }
 0x27a   : > { %s749_s15 = scalar_lea.sflag [#allocation5], %s748_s17 }
 0x27b   : > { %p856_p11 = pnand %p1405_p10, %p1153_p4 }
 0x27d   : > { %p857_p0 = pneg %p856_p11 }
 0x27f   : > { %1022 = dma.done.wait (%p857_p0), %s749_s15, 128  }
 0x280   : > { %1024 = vsyncadd (%p857_p0), %s749_s15, 4294967168  ;;  %p20_p2 = scmp.ge.s32.totalorder %s1128_s11, 4   ;;  %s1406_s21 = smov %s1031_s22 }
 0x281   : > { %s1407_s22 = smov %s1035_s23  ;;  %s1408_s23 = smov %s1140_s14 }
 0x282   : > { %s1409_s24 = smov %s1128_s11  ;;  %22 = sbr.rel (!%p20_p2) target bundleno = 6 (0x6), region = 100 }
 0x287   :  { %755 = vsyncpa [#allocation4], 1 }
 0x288   :  { %757 = vsyncpa [#allocation4 + $0x1], 1 }
 0x289   :  { %758 = vsyncpa [#allocation7], 1 }
 0x28a   :  { %759 = vsyncpa [#allocation5], 1 }
 0x28b   :  { %761 = vsyncpa [#allocation5 + $0x1], 1 }

</bundles_post_ra>
